<compile_context>
chip_gen: v7x
topology: tpu7x:2x2x1
jax: 0.10.0
libtpu: 0.0.40
codegen_flags: <defaults>
</compile_context>

<pallas_src>
import functools

import numpy as np
import jax
import jax.numpy as jnp
from jax.experimental import pallas as pl
from jax.experimental.pallas import tpu as pltpu

LANE = 128


def _round_up(n, m):
    return ((n + m - 1) // m) * m


def _blur_matrix(ho, wo):
    """Decimating [1,2,1]x[1,2,1]/16 blur with ReflectionPad2d(1), stride 2,
    expressed as a dense (Hd*Wd, Ho*Wo) matrix on the row-major flattened image."""
    hd, wd = (ho - 1) // 2 + 1, (wo - 1) // 2 + 1
    f = np.array([1.0, 2.0, 1.0], np.float64) / 4.0

    def refl(i, n):
        return -i if i < 0 else (2 * n - 2 - i if i >= n else i)

    v = np.zeros((hd, ho), np.float64)
    h = np.zeros((wd, wo), np.float64)
    for o in range(hd):
        for t in range(3):
            v[o, refl(2 * o - 1 + t, ho)] += f[t]
    for o in range(wd):
        for t in range(3):
            h[o, refl(2 * o - 1 + t, wo)] += f[t]
    return np.einsum("ah,bw->abhw", v, h).reshape(hd * wd, ho * wo).astype(np.float32)


# ---------------------------------------------------------------------------
# Fused kernels: conv (as one big matmul) + bias + LeakyReLU [+ blur-downsample]
# ---------------------------------------------------------------------------
def _conv_down_kernel(lhs_ref, w_ref, b_ref, blur_ref, o_ref, *, neg_slope):
    # lhs_ref:  (Ho*Wo, kh*kw*Cin) bf16   im2col rows for one image
    # w_ref:    (kh*kw*Cin, Cpad)  bf16
    # b_ref:    (1, Cpad)          f32    dense(t_emb)[+cond][+conv bias], lane-padded
    # blur_ref: (Hd*Wd, Ho*Wo)     f32    decimating blur matrix (reflection folded)
    # o_ref:    (Hd*Wd, Cpad)      f32
    y = jnp.dot(lhs_ref[...], w_ref[...], preferred_element_type=jnp.float32)
    y = y + b_ref[...]
    y = jnp.where(y >= 0.0, y, neg_slope * y)            # LeakyReLU(0.2)
    o_ref[...] = jnp.dot(blur_ref[...], y,
                         preferred_element_type=jnp.float32).astype(o_ref.dtype)


def _conv_kernel(lhs_ref, w_ref, b_ref, o_ref, *, neg_slope):
    y = jnp.dot(lhs_ref[...], w_ref[...], preferred_element_type=jnp.float32)
    y = y + b_ref[...]
    o_ref[...] = jnp.where(y >= 0.0, y, neg_slope * y).astype(o_ref.dtype)


# ---------------------------------------------------------------------------
# ConvBlock_cond.forward
# ---------------------------------------------------------------------------
def conv_block_cond_forward(params, x, t_emb, other_cond=None, *,
                            padding=1, downsample=True, neg_slope=0.2):
    conv_w = params["conv_w"]
    B, Cin, H, W = x.shape
    Cout, _, kh, kw = conv_w.shape
    Cpad = _round_up(Cout, LANE)
    Hp, Wp = H + 2 * padding, W + 2 * padding
    Ho, Wo = Hp - kh + 1, Wp - kw + 1
    K = kh * kw * Cin
    M1 = Ho * Wo

    # -- wrapper glue (fused by XLA): per-(B,C) bias, im2col LHS, weight matrix --
    bias = (t_emb.astype(jnp.float32) @ params["dense_w"].T.astype(jnp.float32)
            + params["dense_b"].astype(jnp.float32))
    if other_cond is not None:
        bias = bias + (other_cond.astype(jnp.float32)
                       @ params["dense_other_w"].T.astype(jnp.float32)
                       + params["dense_other_b"].astype(jnp.float32))
    if params.get("conv_b") is not None:
        bias = bias + params["conv_b"].astype(jnp.float32)
    bias = jnp.pad(bias, ((0, 0), (0, Cpad - Cout))).reshape(B, 1, Cpad)

    xh = jnp.transpose(x, (0, 2, 3, 1))                             # NCHW -> NHWC
    xh = jnp.pad(xh, ((0, 0), (padding, padding), (padding, padding), (0, 0)))
    patches = [xh[:, i:i + Ho, j:j + Wo, :] for i in range(kh) for j in range(kw)]
    lhs = jnp.concatenate(patches, axis=-1).reshape(B, M1, K).astype(jnp.bfloat16)

    wm = jnp.transpose(conv_w, (2, 3, 1, 0)).reshape(K, Cout)
    wm = jnp.pad(wm, ((0, 0), (0, Cpad - Cout))).astype(jnp.bfloat16)

    cp = pltpu.CompilerParams(
        dimension_semantics=("parallel",),
        vmem_limit_bytes=32 * 1024 * 1024)   # actual usage is ~1 MB; safe on v5e/v6e/v7x

    if downsample:
        Hd, Wd = (Ho - 1) // 2 + 1, (Wo - 1) // 2 + 1
        M2 = Hd * Wd
        blur = jnp.asarray(_blur_matrix(Ho, Wo), jnp.float32)
        out_flat = pl.pallas_call(
            functools.partial(_conv_down_kernel, neg_slope=neg_slope),
            out_shape=jax.ShapeDtypeStruct((B, M2, Cpad), jnp.float32),
            grid=(B,),
            in_specs=[
                pl.BlockSpec((None, M1, K), lambda b: (b, 0, 0)),
                pl.BlockSpec((K, Cpad), lambda b: (0, 0)),
                pl.BlockSpec((None, 1, Cpad), lambda b: (b, 0, 0)),
                pl.BlockSpec((M2, M1), lambda b: (0, 0)),
            ],
            out_specs=pl.BlockSpec((None, M2, Cpad), lambda b: (b, 0, 0)),
            compiler_params=cp,
        )(lhs, wm, bias, blur)
        out = out_flat[:, :, :Cout].reshape(B, Hd, Wd, Cout)
    else:
        out_flat = pl.pallas_call(
            functools.partial(_conv_kernel, neg_slope=neg_slope),
            out_shape=jax.ShapeDtypeStruct((B, M1, Cpad), jnp.float32),
            grid=(B,),
            in_specs=[
                pl.BlockSpec((None, M1, K), lambda b: (b, 0, 0)),
                pl.BlockSpec((K, Cpad), lambda b: (0, 0)),
                pl.BlockSpec((None, 1, Cpad), lambda b: (b, 0, 0)),
            ],
            out_specs=pl.BlockSpec((None, M1, Cpad), lambda b: (b, 0, 0)),
            compiler_params=cp,
        )(lhs, wm, bias)
        out = out_flat[:, :, :Cout].reshape(B, Ho, Wo, Cout)

    return jnp.transpose(out, (0, 3, 1, 2))                         # NHWC -> NCHW


# ---------------------------------------------------------------------------
# Pure-JAX reference (tolerance check for the bf16-MXU / f32-accumulation path)
# ---------------------------------------------------------------------------
def _reference(params, x, t_emb, padding=1, neg_slope=0.2, downsample=True):
    out = jax.lax.conv_general_dilated(
        x, params["conv_w"], window_strides=(1, 1),
        padding=[(padding, padding)] * 2,
        dimension_numbers=("NCHW", "OIHW", "NCHW"))
    bias = t_emb @ params["dense_w"].T + params["dense_b"]
    out = out + bias[:, :, None, None]
    out = jnp.where(out >= 0, out, neg_slope * out)
    if not downsample:
        return out
    a = jnp.array([1.0, 2.0, 1.0], jnp.float32)
    f = (a[:, None] * a[None, :]) / 16.0
    C = out.shape[1]
    fw = jnp.tile(f[None, None], (C, 1, 1, 1))
    xp = jnp.pad(out, ((0, 0), (0, 0), (1, 1), (1, 1)), mode="reflect")
    return jax.lax.conv_general_dilated(
        xp, fw, window_strides=(2, 2), padding=[(0, 0)] * 2,
        feature_group_count=C, dimension_numbers=("NCHW", "OIHW", "NCHW"))


if __name__ == "__main__":
    key = jax.random.PRNGKey(0)
    B, Cin, Cout, H, W, T = 2, 4, 64, 16, 16, 32
    kx, kt, kcw, kdw, kdb = jax.random.split(key, 5)
    x = jax.random.normal(kx, (B, Cin, H, W), jnp.float32)
    t_emb = jax.random.normal(kt, (B, T), jnp.float32)
    params = {
        "conv_w": 0.05 * jax.random.normal(kcw, (Cout, Cin, 4, 4), jnp.float32),
        "conv_b": None,   # nn.Conv2d(..., bias=use_bias=None) -> no conv bias
        "dense_w": 0.05 * jax.random.normal(kdw, (Cout, T), jnp.float32),
        "dense_b": 0.05 * jax.random.normal(kdb, (Cout,), jnp.float32),
    }

    # downsample=True (module default)
    out = conv_block_cond_forward(params, x, t_emb, other_cond=None,
                                  padding=1, downsample=True)
    out = jax.block_until_ready(out)
    assert out.shape == (B, Cout, 8, 8), out.shape
    assert bool(jnp.all(jnp.isfinite(out)))
    ref = _reference(params, x, t_emb, downsample=True)
    err = float(jnp.max(jnp.abs(out - ref)))
    assert err < 3e-2, f"downsample path max abs err {err}"   # bf16 MXU, f32 acc

    # downsample=False path
    out2 = conv_block_cond_forward(params, x, t_emb, other_cond=None,
                                   padding=1, downsample=False)
    out2 = jax.block_until_ready(out2)
    assert out2.shape == (B, Cout, 15, 15), out2.shape
    ref2 = _reference(params, x, t_emb, downsample=False)
    err2 = float(jnp.max(jnp.abs(out2 - ref2)))
    assert err2 < 3e-2, f"conv path max abs err {err2}"

    print("KERNEL_OK")
</pallas_src>

<mosaic_0001>
module attributes {stable_mosaic.version = 11 : i64} {
  func.func @_conv_down_kernel(%arg0: i32, %arg1: memref<1x225x64xbf16, #tpu.memory_space<vmem>>, %arg2: memref<64x128xbf16, #tpu.memory_space<vmem>>, %arg3: memref<1x1x128xf32, #tpu.memory_space<vmem>>, %arg4: memref<64x225xf32, #tpu.memory_space<vmem>>, %arg5: memref<1x64x128xf32, #tpu.memory_space<vmem>>) attributes {dimension_semantics = [#tpu.dimension_semantics<parallel>], iteration_bounds = array<i64: 2>, scalar_prefetch = 0 : i64, scratch_operands = 0 : i64, tpu.core_type = #tpu.core_type<tc>, window_params = [{transform_indices = @transform_0, window_bounds = array<i64: 1, 225, 64>}, {pipeline_mode = #tpu.pipeline_mode<synchronous>, transform_indices = @transform_1, window_bounds = array<i64: 64, 128>}, {transform_indices = @transform_2, window_bounds = array<i64: 1, 1, 128>}, {pipeline_mode = #tpu.pipeline_mode<synchronous>, transform_indices = @transform_3, window_bounds = array<i64: 64, 225>}, {transform_indices = @transform_4, window_bounds = array<i64: 1, 64, 128>}]} {
    %c0 = arith.constant 0 : index
    %c0_0 = arith.constant 0 : index
    %c0_1 = arith.constant 0 : index
    %0 = vector.load %arg1[%c0, %c0_0, %c0_1] : memref<1x225x64xbf16, #tpu.memory_space<vmem>>, vector<1x225x64xbf16>
    %1 = vector.shape_cast %0 : vector<1x225x64xbf16> to vector<225x64xbf16>
    %c0_2 = arith.constant 0 : index
    %c0_3 = arith.constant 0 : index
    %2 = vector.load %arg2[%c0_2, %c0_3] : memref<64x128xbf16, #tpu.memory_space<vmem>>, vector<64x128xbf16>
    %cst = arith.constant dense<0.000000e+00> : vector<225x128xf32>
    %3 = tpu.matmul %1, %2, %cst {dimension_numbers = #tpu.dot_dimension_numbers<[1], [0], [0], [1], [0, 0, 1, 1], [], []>} : vector<225x64xbf16>, vector<64x128xbf16>, vector<225x128xf32> -> vector<225x128xf32>
    %c0_4 = arith.constant 0 : index
    %c0_5 = arith.constant 0 : index
    %c0_6 = arith.constant 0 : index
    %4 = vector.load %arg3[%c0_4, %c0_5, %c0_6] : memref<1x1x128xf32, #tpu.memory_space<vmem>>, vector<1x1x128xf32>
    %5 = vector.shape_cast %4 : vector<1x1x128xf32> to vector<1x128xf32>
    %6 = vector.broadcast %5 : vector<1x128xf32> to vector<225x128xf32>
    %7 = arith.addf %3, %6 : vector<225x128xf32>
    %cst_7 = arith.constant 0.000000e+00 : f32
    %8 = vector.broadcast %cst_7 : f32 to vector<225x128xf32>
    %9 = arith.cmpf oge, %7, %8 : vector<225x128xf32>
    %cst_8 = arith.constant 2.000000e-01 : f32
    %10 = vector.broadcast %cst_8 : f32 to vector<225x128xf32>
    %11 = arith.mulf %10, %7 : vector<225x128xf32>
    %12 = arith.select %9, %7, %11 : vector<225x128xi1>, vector<225x128xf32>
    %c0_9 = arith.constant 0 : index
    %c0_10 = arith.constant 0 : index
    %13 = vector.load %arg4[%c0_9, %c0_10] : memref<64x225xf32, #tpu.memory_space<vmem>>, vector<64x225xf32>
    %cst_11 = arith.constant dense<0.000000e+00> : vector<64x128xf32>
    %14 = tpu.matmul %13, %12, %cst_11 {dimension_numbers = #tpu.dot_dimension_numbers<[1], [0], [0], [1], [0, 0, 1, 1], [], []>} : vector<64x225xf32>, vector<225x128xf32>, vector<64x128xf32> -> vector<64x128xf32>
    %c0_12 = arith.constant 0 : index
    %c0_13 = arith.constant 0 : index
    %c0_14 = arith.constant 0 : index
    %15 = vector.load %arg5[%c0_12, %c0_13, %c0_14] : memref<1x64x128xf32, #tpu.memory_space<vmem>>, vector<1x64x128xf32>
    %16 = vector.shape_cast %15 : vector<1x64x128xf32> to vector<64x128xf32>
    %17 = vector.shape_cast %14 : vector<64x128xf32> to vector<1x64x128xf32>
    tpu.vector_store %arg5[%c0_12, %c0_13, %c0_14], %17 {strides = array<i32>} : memref<1x64x128xf32, #tpu.memory_space<vmem>>, vector<1x64x128xf32>,
    return
  }
  func.func @transform_0(%arg0: i32) -> (i32, i32, i32) {
    %c0_i32 = arith.constant 0 : i32
    %c0_i32_0 = arith.constant 0 : i32
    %c0_i32_1 = arith.constant 0 : i32
    return %arg0, %c0_i32, %c0_i32_0 : i32, i32, i32
  }
  func.func @transform_1(%arg0: i32) -> (i32, i32) {
    %c0_i32 = arith.constant 0 : i32
    %c0_i32_0 = arith.constant 0 : i32
    %c0_i32_1 = arith.constant 0 : i32
    return %c0_i32, %c0_i32_0 : i32, i32
  }
  func.func @transform_2(%arg0: i32) -> (i32, i32, i32) {
    %c0_i32 = arith.constant 0 : i32
    %c0_i32_0 = arith.constant 0 : i32
    %c0_i32_1 = arith.constant 0 : i32
    return %arg0, %c0_i32, %c0_i32_0 : i32, i32, i32
  }
  func.func @transform_3(%arg0: i32) -> (i32, i32) {
    %c0_i32 = arith.constant 0 : i32
    %c0_i32_0 = arith.constant 0 : i32
    %c0_i32_1 = arith.constant 0 : i32
    return %c0_i32, %c0_i32_0 : i32, i32
  }
  func.func @transform_4(%arg0: i32) -> (i32, i32, i32) {
    %c0_i32 = arith.constant 0 : i32
    %c0_i32_0 = arith.constant 0 : i32
    %c0_i32_1 = arith.constant 0 : i32
    return %arg0, %c0_i32, %c0_i32_0 : i32, i32, i32
  }
}

</mosaic_0001>

<bundles_post_ra>
// kernel: tpu_custom_call.1
= control target key start
LH: loop header
LB: loop body
LE: loop exit
PB: predicated region body
PF: predicated region fallthrough
CT: control target
= control target key end

     0   :  { %9 = vsyncpa [#allocation3], 0  ;;  %s1518_s0 = inlined_call_operand.vmem [shape: bf16[2,225,64], index: 0, kind: input, shape index: {}]   ;;  %s1519_s1 = inlined_call_operand.vmem [shape: bf16[64,128], index: 1, kind: input, shape index: {}]   ;;  %s1520_s2 = inlined_call_operand.vmem [shape: f32[2,1,128], index: 2, kind: input, shape index: {}]   ;;  %s1521_s3 = inlined_call_operand.vmem [shape: f32[64,225], index: 3, kind: input, shape index: {}]   ;;  %s1522_s4 = inlined_call_operand.hbm [shape: f32[2,64,128], index: 4, kind: output, shape index: {}]  }
   0x1   :  { %11 = vsyncpa [#allocation3 + $0x1], 0  ;;  %s1224_s15 = smov 0   ;;  %s1226_s16 = smov 0  }
   0x2   :  { %s1228_s17 = smov 0   ;;  %s1230_s18 = smov 0  }
   0x3 LB: > { %s1245_s19 = sadd.s32 4294967295, %s1191_s18   ;;  %s880_s20 = sadd.s32 4294967294, %s1191_s18   ;;  %s1191_s18 = sphi %s1230_s18, %s1528_s18   ;;  %s1187_s17 = sphi %s1228_s17, %s1527_s17   ;;  %s1183_s16 = sphi %s1226_s16, %s1526_s16   ;;  %s1179_s15 = sphi %s1224_s15, %s1525_s15  }
   0x4   : > { %s1249_s21 = sadd.s32 1, %s1191_s18   ;;  %s118_s22 = sadd.s32 1, %s1187_s17 }
   0x5   : > { %s115_s23 = ssub.s32 %s1191_s18, %s1249_s21  ;;  %p128_p0 = scmp.ne.s32.totalorder %s1187_s17, %s1183_s16 }
   0x6   : > { %p116_p1 = scmp.eq.s32.totalorder %s115_s23, 0  ;;  %p129_p2 = scmp.eq.s32.totalorder %s1245_s19, 1 }
   0x7   : > { %p134_p3 = scmp.ne.s32.totalorder %s1183_s16, %s1179_s15  ;;  %p135_p4 = scmp.eq.s32.totalorder %s880_s20, 1 }
   0x8   : > { %s1260_s24 = scalar_select %p116_p1, %s1187_s17, %s118_s22  }
   0x9   : > { %p1262_p5 = por %p129_p2, %p128_p0  ;;  %p1266_p6 = por %p135_p4, %p134_p3 }
   0xa   : > { %p883_p7 = scmp.ge.s32.totalorder %s1191_s18, 1  ;;  %p173_p8 = scmp.lt.s32.totalorder %s1191_s18, 3 }
   0xc   : > { %p174_p9 = pnand %p883_p7, %p173_p8 }
   0xd   : > { %v1110_v0 = vld [vmem:[%s1519_s1] sm:$0xff] (!%p174_p9)   ;;  %v1193_v1 = vmov (!%p174_p9), 0.0   ;;  %v1111_v2 = vld [vmem:[%s1519_s1 + $0x8] sm:$0xff] (!%p174_p9)   ;;  %vm1194_vm0 = vmmov (!%p174_p9), 0   ;;  %p202_p10 = scmp.lt.s32.totalorder (!%p174_p9), %s1245_s19, 1  ;;  %v1112_v3 = vld [vmem:[%s1519_s1 + $0x10] sm:$0xff] (!%p174_p9)  }
   0xe   : > { %177 = sbr.rel (%p174_p9) target bundleno = 615 (0x267), region = 36  ;;  %955 = vmatprep.subr.bf16.mxu0 (!%p174_p9), %v1193_v1  ;;  %963 = vmatprep.mubr.msk.bf16.mxu0 (!%p174_p9), %vm1194_vm0, %v1193_v1  ;;  %v1113_v4 = vld [vmem:[%s1519_s1 + $0x18] sm:$0xff] (!%p174_p9)   ;;  %vm352_vm1 = vcmask (!%p174_p9), 523264   ;;  %v1195_v18 = vmov (!%p174_p9), 0.0|0.0   ;;  %v638_v21 = vld [vmem:[%s1521_s3 + $0x8] sm:$0xff] (!%p174_p9)  ;;  %vm653_vm2 = vcmask (!%p174_p9), 793600  }
   0xf   : > { %956 = vmatpush3.bf16.msra.mxu0 (!%p174_p9), %v1110_v0  ;;  %1023 = vmatprep.subr.bf16.mxu1 (!%p174_p9), %v1195_v18  ;;  %s199_s20 = sand.u32 (!%p174_p9), 1, %s1183_s16   ;;  %s935_s28 = sshll.u32 (!%p174_p9), %s1245_s19, 10 }
  0x10   : > { %957 = vmatprep.subr.bf16.mxu0 (!%p174_p9), %v1193_v1  ;;  %922 = vmatprep.mubr.msk.f32.mxu1 (!%p174_p9), %vm653_vm2, %v638_v21  ;;  %s884_s22 = sshll.u32 (!%p174_p9), %s199_s20, 6  ;;  %s1477_s6 = scalar_lea.sflag (!%p174_p9), [#allocation3], %s199_s20 }
  0x11   : > { %s201_s23 = scalar_lea.vmem (!%p174_p9), [#allocation2], %s884_s22  ;;  %s1196_s7 = smov (!%p174_p9), [#allocation2]  }
  0x13   : > { %958 = vmatpush3.bf16.msra.mxu0 (!%p174_p9), %v1111_v2 }
  0x14   : > { %959 = vmatprep.subr.bf16.mxu0 (!%p174_p9), %v1193_v1 }
  0x15   : > { %s1284_s5 = scalar_select %p202_p10, %s1245_s19, 1 }
  0x17   : > { %s1065_s8 = smul.u32 116, %s1284_s5  ;;  %960 = vmatpush3.bf16.msra.mxu0 %v1112_v3  ;;  %s209_s27 = scalar_lea.vmem %s1520_s2, %s1284_s5 }
  0x18   : > { %961 = vmatprep.subr.bf16.mxu0 %v1193_v1  ;;  %v1367_v22 = vld [vmem:[%s209_s27] ss:$0 sm:$0xff]  ;;  %s809_s27 = sshll.u32 %s201_s23, 4  ;;  %s1473_s5 = scalar_lea.hbm %s1522_s4, %s935_s28  ;;  %s1468_s27 = int_to_ptr.vmem [resolvable:$true] %s809_s27 }
  0x19   : > { %s1294_s11 = scalar_lea.vmem %s1518_s0, %s1065_s8  ;;  %s1129_s19 = scalar_lea.vmem %s1468_s27, 1024 }
  0x1a   : > { %v1114_v5 = vld [vmem:[%s1294_s11] sm:$0xff]   ;;  %v1115_v6 = vld [vmem:[%s1294_s11 + $0x8] sm:$0xff]   ;;  %v1116_v7 = vld [vmem:[%s1294_s11 + $0x10] sm:$0xff]   ;;  %p1130_p11 = scmp.ne.s32.totalorder %s1468_s27, %s1129_s19  ;;  %s1133_s8 = sshll.u32 %s1196_s7, 4  ;;  %s1134_s8 = int_to_ptr.vmem [resolvable:$false] %s1133_s8 }
  0x1b   : > { %962 = vmatpush3.bf16.msra.mxu0 %v1113_v4  ;;  %v1117_v8 = vld [vmem:[%s1294_s11 + $0x18] sm:$0xff]   ;;  %v1118_v9 = vld [vmem:[%s1294_s11 + $0x20] sm:$0xff]   ;;  %v1119_v10 = vld [vmem:[%s1294_s11 + $0x28] sm:$0xff]   ;;  %s1135_s9 = scalar_lea.vmem %s1134_s8, 2048  ;;  %p1136_p0 = scmp.lt.s32.totalorder %s1468_s27, %s1134_s8 }
  0x1c   : > { %v1120_v11 = vld [vmem:[%s1294_s11 + $0x30] sm:$0xff]   ;;  %v1121_v12 = vld [vmem:[%s1294_s11 + $0x38] sm:$0xff]   ;;  %v1122_v13 = vld [vmem:[%s1294_s11 + $0x40] sm:$0xff]   ;;  %p1131_p12 = pnand %p1130_p11, %p1262_p5  ;;  %p1137_p1 = scmp.lt.s32.totalorder %s1135_s9, %s1129_s19 }
  0x1d   : > { %v1123_v14 = vld [vmem:[%s1294_s11 + $0x48] sm:$0xff]   ;;  %v1124_v15 = vld [vmem:[%s1294_s11 + $0x50] sm:$0xff]   ;;  %v1125_v16 = vld [vmem:[%s1294_s11 + $0x58] sm:$0xff]  }
  0x1e   : > { %964 = vmatmul.mubr.msk.bf16.vlgmr.msra.gmra.mrb[0].mxu0 %vm352_vm1, %v1114_v5  ;;  %v1126_v17 = vld [vmem:[%s1294_s11 + $0x60] sm:$0xff]   ;;  %v1127_v19 = vld [vmem:[%s1294_s11 + $0x68] sm:$0xff]   ;;  %v1128_v20 = vld [vmem:[%s1294_s11 + $0x70] ss:$0 sps:$4 sm:$0x11]   ;;  %p1132_p13 = pneg %p1131_p12  ;;  %p1138_p2 = por %p1137_p1, %p1136_p0 }
  0x1f   : > { %967 = vmatprep.mubr.msk.bf16.mxu0 %vm1194_vm0, %v1193_v1 }
  0x20   : > { %p1139_p3 = pnand %p1138_p2, %p1132_p13 }
  0x26   : > { %968 = vmatmul.mubr.msk.bf16.gmra.mrb[4].mxu0 %vm352_vm1, %v1115_v6 }
  0x27   : > { %971 = vmatprep.mubr.msk.bf16.mxu0 %vm1194_vm0, %v1193_v1 }
  0x2e   : > { %972 = vmatmul.mubr.msk.bf16.gmra.mrb[8].mxu0 %vm352_vm1, %v1116_v7 }
  0x2f   : > { %975 = vmatprep.mubr.msk.bf16.mxu0 %vm1194_vm0, %v1193_v1 }
  0x36   : > { %976 = vmatmul.mubr.msk.bf16.gmra.mrb[12].mxu0 %vm352_vm1, %v1117_v8 }
  0x37   : > { %979 = vmatprep.mubr.msk.bf16.mxu0 %vm1194_vm0, %v1193_v1 }
  0x3e   : > { %980 = vmatmul.mubr.msk.bf16.gmra.mrb[16].mxu0 %vm352_vm1, %v1118_v9 }
  0x3f   : > { %983 = vmatprep.mubr.msk.bf16.mxu0 %vm1194_vm0, %v1193_v1 }
  0x46   : > { %984 = vmatmul.mubr.msk.bf16.gmra.mrb[20].mxu0 %vm352_vm1, %v1119_v10 }
  0x47   : > { %987 = vmatprep.mubr.msk.bf16.mxu0 %vm1194_vm0, %v1193_v1 }
  0x4e   : > { %988 = vmatmul.mubr.msk.bf16.gmra.mrb[24].mxu0 %vm352_vm1, %v1120_v11 }
  0x4f   : > { %991 = vmatprep.mubr.msk.bf16.mxu0 %vm1194_vm0, %v1193_v1 }
  0x56   : > { %992 = vmatmul.mubr.msk.bf16.gmra.mrb[28].mxu0 %vm352_vm1, %v1121_v12 }
  0x57   : > { %995 = vmatprep.mubr.msk.bf16.mxu0 %vm1194_vm0, %v1193_v1 }
  0x5e   : > { %996 = vmatmul.mubr.msk.bf16.gmra.mrb[32].mxu0 %vm352_vm1, %v1122_v13 }
  0x5f   : > { %999 = vmatprep.mubr.msk.bf16.mxu0 %vm1194_vm0, %v1193_v1 }
  0x66   : > { %1000 = vmatmul.mubr.msk.bf16.gmra.mrb[36].mxu0 %vm352_vm1, %v1123_v14 }
  0x67   : > { %1003 = vmatprep.mubr.msk.bf16.mxu0 %vm1194_vm0, %v1193_v1 }
  0x6e   : > { %1004 = vmatmul.mubr.msk.bf16.gmra.mrb[40].mxu0 %vm352_vm1, %v1124_v15 }
  0x6f   : > { %1007 = vmatprep.mubr.msk.bf16.mxu0 %vm1194_vm0, %v1193_v1 }
  0x76   : > { %1008 = vmatmul.mubr.msk.bf16.gmra.mrb[44].mxu0 %vm352_vm1, %v1125_v16 }
  0x77   : > { %1011 = vmatprep.mubr.msk.bf16.mxu0 %vm1194_vm0, %v1193_v1 }
  0x7e   : > { %1012 = vmatmul.mubr.msk.bf16.gmra.mrb[48].mxu0 %vm352_vm1, %v1126_v17 }
  0x7f   : > { %1015 = vmatprep.mubr.msk.bf16.mxu0 %vm1194_vm0, %v1193_v1 }
  0x86   : > { %1016 = vmatmul.mubr.msk.bf16.gmra.mrb[52].mxu0 %vm352_vm1, %v1127_v19 }
  0x87   : > { %1019 = vmatprep.mubr.msk.bf16.mxu0 %vm1194_vm0, %v1193_v1 }
  0x8e   : > { %1020 = vmatmul.mubr.msk.bf16.gmra.mrb[56].mxu0 %vm352_vm1, %v1128_v20 }
  0xf1   : > { %v432_v23 = vpop.f32.mrb[0].mxu0 }
  0xf2   : > { %v433_v24 = vadd.f32 %v1367_v22, %v432_v23  ;;  %v965_v25 = vpop.f32.mrb[1].mxu0 }
  0xf3   : > { %v435_v26 = vpop.f32.mrb[2].mxu0 }
  0xf4   : > { %v579_v27 = vmul.f32 0.2, %v433_v24  ;;  %v436_v28 = vadd.f32 %v1367_v22, %v435_v26  ;;  %v966_v29 = vpop.f32.mrb[3].mxu0  ;;  %vm550_vm3 = vcmp.ge.f32.partialorder %v433_v24, 0.0 }
  0xf6   : > { %v580_v30 = vmul.f32 0.2, %v436_v28  ;;  %vm551_vm4 = vcmp.ge.f32.partialorder %v436_v28, 0.0  ;;  %v608_v31 = vsel %vm550_vm3, %v433_v24, %v579_v27 }
  0xf8   : > { %v609_v32 = vsel %vm551_vm4, %v436_v28, %v580_v30 }
  0xf9   : > { %v440_v33 = vpop.f32.mrb[4].mxu0  ;;  %v1024_v34 = vpack.c.bf16 %v609_v32, %v608_v31 }
  0xfa   : > { %v441_v35 = vadd.f32 %v1367_v22, %v440_v33  ;;  %v969_v36 = vpop.f32.mrb[5].mxu0 }
  0xfb   : > { %v443_v37 = vpop.f32.mrb[6].mxu0  ;;  %1025 = vmatpush1.bf16.msra.mxu1 %v1024_v34 }
  0xfc   : > { %v581_v38 = vmul.f32 0.2, %v441_v35  ;;  %v444_v39 = vadd.f32 %v1367_v22, %v443_v37  ;;  %v970_v40 = vpop.f32.mrb[7].mxu0  ;;  %1026 = vmatprep.subr.bf16.mxu1 %v1195_v18  ;;  %vm552_vm5 = vcmp.ge.f32.partialorder %v441_v35, 0.0 }
  0xfe   : > { %vm553_vm6 = vcmp.ge.f32.partialorder %v444_v39, 0.0  ;;  %v582_v41 = vmul.f32 0.2, %v444_v39  ;;  %v610_v42 = vsel %vm552_vm5, %v441_v35, %v581_v38 }
 0x100   : > { %v611_v43 = vsel %vm553_vm6, %v444_v39, %v582_v41 }
 0x101   : > { %v448_v44 = vpop.f32.mrb[8].mxu0  ;;  %v1027_v45 = vpack.c.bf16 %v611_v43, %v610_v42 }
 0x102   : > { %v449_v46 = vadd.f32 %v1367_v22, %v448_v44  ;;  %v973_v47 = vpop.f32.mrb[9].mxu0 }
 0x103   : > { %v451_v48 = vpop.f32.mrb[10].mxu0  ;;  %1028 = vmatpush1.bf16.msra.mxu1 %v1027_v45 }
 0x104   : > { %v583_v49 = vmul.f32 0.2, %v449_v46  ;;  %v452_v50 = vadd.f32 %v1367_v22, %v451_v48  ;;  %v974_v51 = vpop.f32.mrb[11].mxu0  ;;  %1029 = vmatprep.subr.bf16.mxu1 %v1195_v18  ;;  %vm554_vm7 = vcmp.ge.f32.partialorder %v449_v46, 0.0 }
 0x106   : > { %vm555_vm8 = vcmp.ge.f32.partialorder %v452_v50, 0.0  ;;  %v584_v52 = vmul.f32 0.2, %v452_v50  ;;  %v612_v53 = vsel %vm554_vm7, %v449_v46, %v583_v49 }
 0x108   : > { %v613_v54 = vsel %vm555_vm8, %v452_v50, %v584_v52 }
 0x109   : > { %v456_v55 = vpop.f32.mrb[12].mxu0  ;;  %v1030_v56 = vpack.c.bf16 %v613_v54, %v612_v53 }
 0x10a   : > { %v457_v57 = vadd.f32 %v1367_v22, %v456_v55  ;;  %v977_v58 = vpop.f32.mrb[13].mxu0 }
 0x10b   : > { %v459_v59 = vpop.f32.mrb[14].mxu0  ;;  %1031 = vmatpush1.bf16.msra.mxu1 %v1030_v56 }
 0x10c   : > { %v585_v60 = vmul.f32 0.2, %v457_v57  ;;  %v460_v61 = vadd.f32 %v1367_v22, %v459_v59  ;;  %v978_v62 = vpop.f32.mrb[15].mxu0  ;;  %1032 = vmatprep.subr.bf16.mxu1 %v1195_v18  ;;  %vm556_vm9 = vcmp.ge.f32.partialorder %v457_v57, 0.0 }
 0x10e   : > { %vm557_vm10 = vcmp.ge.f32.partialorder %v460_v61, 0.0  ;;  %v586_v63 = vmul.f32 0.2, %v460_v61  ;;  %v614_v0 = vsel %vm556_vm9, %v457_v57, %v585_v60 }
 0x110   : > { %v615_v2 = vsel %vm557_vm10, %v460_v61, %v586_v63 }
 0x111   : > { %v464_v3 = vpop.f32.mrb[16].mxu0  ;;  %v1033_v4 = vpack.c.bf16 %v615_v2, %v614_v0 }
 0x112   : > { %v465_v5 = vadd.f32 %v1367_v22, %v464_v3  ;;  %v981_v6 = vpop.f32.mrb[17].mxu0 }
 0x113   : > { %v467_v7 = vpop.f32.mrb[18].mxu0  ;;  %1034 = vmatpush1.bf16.msra.mxu1 %v1033_v4 }
 0x114   : > { %v587_v8 = vmul.f32 0.2, %v465_v5  ;;  %v468_v9 = vadd.f32 %v1367_v22, %v467_v7  ;;  %v982_v10 = vpop.f32.mrb[19].mxu0  ;;  %1035 = vmatprep.subr.bf16.mxu1 %v1195_v18  ;;  %vm558_vm11 = vcmp.ge.f32.partialorder %v465_v5, 0.0 }
 0x116   : > { %vm559_vm12 = vcmp.ge.f32.partialorder %v468_v9, 0.0  ;;  %v588_v11 = vmul.f32 0.2, %v468_v9  ;;  %v616_v12 = vsel %vm558_vm11, %v465_v5, %v587_v8 }
 0x118   : > { %v617_v13 = vsel %vm559_vm12, %v468_v9, %v588_v11 }
 0x119   : > { %v472_v14 = vpop.f32.mrb[20].mxu0  ;;  %v1036_v15 = vpack.c.bf16 %v617_v13, %v616_v12 }
 0x11a   : > { %v473_v16 = vadd.f32 %v1367_v22, %v472_v14  ;;  %v985_v17 = vpop.f32.mrb[21].mxu0 }
 0x11b   : > { %v475_v19 = vpop.f32.mrb[22].mxu0  ;;  %1037 = vmatpush1.bf16.msra.mxu1 %v1036_v15 }
 0x11c   : > { %v589_v20 = vmul.f32 0.2, %v473_v16  ;;  %v476_v21 = vadd.f32 %v1367_v22, %v475_v19  ;;  %v986_v23 = vpop.f32.mrb[23].mxu0  ;;  %1038 = vmatprep.subr.bf16.mxu1 %v1195_v18  ;;  %vm560_vm13 = vcmp.ge.f32.partialorder %v473_v16, 0.0 }
 0x11e   : > { %vm561_vm14 = vcmp.ge.f32.partialorder %v476_v21, 0.0  ;;  %v590_v24 = vmul.f32 0.2, %v476_v21  ;;  %v618_v25 = vsel %vm560_vm13, %v473_v16, %v589_v20 }
 0x120   : > { %v619_v26 = vsel %vm561_vm14, %v476_v21, %v590_v24 }
 0x121   : > { %v480_v27 = vpop.f32.mrb[24].mxu0  ;;  %v1039_v28 = vpack.c.bf16 %v619_v26, %v618_v25 }
 0x122   : > { %v481_v29 = vadd.f32 %v1367_v22, %v480_v27  ;;  %v989_v30 = vpop.f32.mrb[25].mxu0 }
 0x123   : > { %v483_v31 = vpop.f32.mrb[26].mxu0  ;;  %1040 = vmatpush1.bf16.msra.mxu1 %v1039_v28 }
 0x124   : > { %v591_v32 = vmul.f32 0.2, %v481_v29  ;;  %v484_v33 = vadd.f32 %v1367_v22, %v483_v31  ;;  %v990_v34 = vpop.f32.mrb[27].mxu0  ;;  %1041 = vmatprep.subr.bf16.mxu1 %v1195_v18  ;;  %vm562_vm15 = vcmp.ge.f32.partialorder %v481_v29, 0.0 }
 0x126   : > { %vm563_vm0 = vcmp.ge.f32.partialorder %v484_v33, 0.0  ;;  %v592_v35 = vmul.f32 0.2, %v484_v33  ;;  %v620_v36 = vsel %vm562_vm15, %v481_v29, %v591_v32 }
 0x128   : > { %v621_v37 = vsel %vm563_vm0, %v484_v33, %v592_v35 }
 0x129   : > { %v488_v38 = vpop.f32.mrb[28].mxu0  ;;  %v1042_v39 = vpack.c.bf16 %v621_v37, %v620_v36 }
 0x12a   : > { %v489_v40 = vadd.f32 %v1367_v22, %v488_v38  ;;  %v993_v41 = vpop.f32.mrb[29].mxu0 }
 0x12b   : > { %v491_v42 = vpop.f32.mrb[30].mxu0  ;;  %1043 = vmatpush1.bf16.msra.mxu1 %v1042_v39 }
 0x12c   : > { %v593_v43 = vmul.f32 0.2, %v489_v40  ;;  %v492_v44 = vadd.f32 %v1367_v22, %v491_v42  ;;  %v994_v45 = vpop.f32.mrb[31].mxu0  ;;  %1044 = vmatprep.subr.bf16.mxu1 %v1195_v18  ;;  %vm564_vm1 = vcmp.ge.f32.partialorder %v489_v40, 0.0 }
 0x12e   : > { %vm565_vm3 = vcmp.ge.f32.partialorder %v492_v44, 0.0  ;;  %v594_v46 = vmul.f32 0.2, %v492_v44  ;;  %v622_v47 = vsel %vm564_vm1, %v489_v40, %v593_v43  ;;  %vm678_vm1 = vcmask 1040384  }
 0x130   : > { %v623_v48 = vsel %vm565_vm3, %v492_v44, %v594_v46 }
 0x131   : > { %v496_v49 = vpop.f32.mrb[32].mxu0  ;;  %v1045_v50 = vpack.c.bf16 %v623_v48, %v622_v47 }
 0x132   : > { %v497_v51 = vadd.f32 %v1367_v22, %v496_v49  ;;  %v997_v52 = vpop.f32.mrb[33].mxu0 }
 0x133   : > { %v499_v53 = vpop.f32.mrb[34].mxu0  ;;  %1046 = vmatpush1.bf16.msra.mxu1 %v1045_v50 }
 0x134   : > { %v595_v54 = vmul.f32 0.2, %v497_v51  ;;  %v500_v55 = vadd.f32 %v1367_v22, %v499_v53  ;;  %v998_v56 = vpop.f32.mrb[35].mxu0  ;;  %1047 = vmatprep.subr.bf16.mxu1 %v1195_v18  ;;  %vm566_vm4 = vcmp.ge.f32.partialorder %v497_v51, 0.0 }
 0x136   : > { %vm567_vm5 = vcmp.ge.f32.partialorder %v500_v55, 0.0  ;;  %v596_v57 = vmul.f32 0.2, %v500_v55  ;;  %v624_v58 = vsel %vm566_vm4, %v497_v51, %v595_v54 }
 0x138   : > { %v625_v59 = vsel %vm567_vm5, %v500_v55, %v596_v57 }
 0x139   : > { %v504_v60 = vpop.f32.mrb[36].mxu0  ;;  %v1048_v61 = vpack.c.bf16 %v625_v59, %v624_v58 }
 0x13a   : > { %v505_v62 = vadd.f32 %v1367_v22, %v504_v60  ;;  %v1001_v63 = vpop.f32.mrb[37].mxu0 }
 0x13b   : > { %v507_v0 = vpop.f32.mrb[38].mxu0  ;;  %1049 = vmatpush1.bf16.msra.mxu1 %v1048_v61  ;;  %v641_v63 = vld [vmem:[%s1521_s3 + $0x20] sm:$0xff] }
 0x13c   : > { %v597_v2 = vmul.f32 0.2, %v505_v62  ;;  %v508_v3 = vadd.f32 %v1367_v22, %v507_v0  ;;  %v1002_v4 = vpop.f32.mrb[39].mxu0  ;;  %1050 = vmatprep.subr.bf16.mxu1 %v1195_v18  ;;  %vm568_vm6 = vcmp.ge.f32.partialorder %v505_v62, 0.0  ;;  %v644_v0 = vld [vmem:[%s1521_s3 + $0x38] sm:$0xff] }
 0x13d   : > { %v645_v4 = vld [vmem:[%s1521_s3 + $0x40] sm:$0xff] }
 0x13e   : > { %vm569_vm7 = vcmp.ge.f32.partialorder %v508_v3, 0.0  ;;  %v598_v5 = vmul.f32 0.2, %v508_v3  ;;  %v626_v6 = vsel %vm568_vm6, %v505_v62, %v597_v2  ;;  %v640_v62 = vld [vmem:[%s1521_s3 + $0x18] sm:$0xff]  ;;  %v643_v2 = vld [vmem:[%s1521_s3 + $0x30] sm:$0xff] }
 0x140   : > { %v627_v7 = vsel %vm569_vm7, %v508_v3, %v598_v5  ;;  %v646_v3 = vld [vmem:[%s1521_s3 + $0x48] sm:$0xff]  ;;  %v648_v5 = vld [vmem:[%s1521_s3 + $0x58] sm:$0xff] }
 0x141   : > { %v512_v8 = vpop.f32.mrb[40].mxu0  ;;  %v1051_v9 = vpack.c.bf16 %v627_v7, %v626_v6  ;;  %v647_v6 = vld [vmem:[%s1521_s3 + $0x50] sm:$0xff]  ;;  %v650_v7 = vld [vmem:[%s1521_s3 + $0x68] sm:$0xff] }
 0x142   : > { %v513_v10 = vadd.f32 %v1367_v22, %v512_v8  ;;  %v1005_v11 = vpop.f32.mrb[41].mxu0  ;;  %v649_v8 = vld [vmem:[%s1521_s3 + $0x60] sm:$0xff] }
 0x143   : > { %v515_v12 = vpop.f32.mrb[42].mxu0  ;;  %1052 = vmatpush1.bf16.msra.mxu1 %v1051_v9  ;;  %v652_v9 = vld [vmem:[%s1521_s3 + $0x78] sm:$0xff] }
 0x144   : > { %v599_v13 = vmul.f32 0.2, %v513_v10  ;;  %v516_v14 = vadd.f32 %v1367_v22, %v515_v12  ;;  %v1006_v15 = vpop.f32.mrb[43].mxu0  ;;  %1053 = vmatprep.subr.bf16.mxu1 %v1195_v18  ;;  %vm570_vm8 = vcmp.ge.f32.partialorder %v513_v10, 0.0 }
 0x146   : > { %vm571_vm9 = vcmp.ge.f32.partialorder %v516_v14, 0.0  ;;  %v600_v16 = vmul.f32 0.2, %v516_v14  ;;  %v628_v17 = vsel %vm570_vm8, %v513_v10, %v599_v13  ;;  %v651_v10 = vld [vmem:[%s1521_s3 + $0x70] sm:$0xff] }
 0x148   : > { %v629_v19 = vsel %vm571_vm9, %v516_v14, %v600_v16 }
 0x149   : > { %v520_v20 = vpop.f32.mrb[44].mxu0  ;;  %v1054_v21 = vpack.c.bf16 %v629_v19, %v628_v17 }
 0x14a   : > { %v521_v23 = vadd.f32 %v1367_v22, %v520_v20  ;;  %v1009_v24 = vpop.f32.mrb[45].mxu0 }
 0x14b   : > { %v523_v25 = vpop.f32.mrb[46].mxu0  ;;  %1055 = vmatpush1.bf16.msra.mxu1 %v1054_v21 }
 0x14c   : > { %v601_v26 = vmul.f32 0.2, %v521_v23  ;;  %v524_v27 = vadd.f32 %v1367_v22, %v523_v25  ;;  %v1010_v28 = vpop.f32.mrb[47].mxu0  ;;  %1056 = vmatprep.subr.bf16.mxu1 %v1195_v18  ;;  %vm572_vm10 = vcmp.ge.f32.partialorder %v521_v23, 0.0 }
 0x14e   : > { %vm573_vm11 = vcmp.ge.f32.partialorder %v524_v27, 0.0  ;;  %v602_v29 = vmul.f32 0.2, %v524_v27  ;;  %v630_v30 = vsel %vm572_vm10, %v521_v23, %v601_v26 }
 0x150   : > { %v631_v31 = vsel %vm573_vm11, %v524_v27, %v602_v29 }
 0x151   : > { %v528_v32 = vpop.f32.mrb[48].mxu0  ;;  %v1057_v33 = vpack.c.bf16 %v631_v31, %v630_v30 }
 0x152   : > { %v529_v34 = vadd.f32 %v1367_v22, %v528_v32  ;;  %v1013_v35 = vpop.f32.mrb[49].mxu0 }
 0x153   : > { %v531_v36 = vpop.f32.mrb[50].mxu0  ;;  %1058 = vmatpush1.bf16.msra.mxu1 %v1057_v33 }
 0x154   : > { %v603_v37 = vmul.f32 0.2, %v529_v34  ;;  %v532_v38 = vadd.f32 %v1367_v22, %v531_v36  ;;  %v1014_v39 = vpop.f32.mrb[51].mxu0  ;;  %1059 = vmatprep.subr.bf16.mxu1 %v1195_v18  ;;  %vm574_vm12 = vcmp.ge.f32.partialorder %v529_v34, 0.0 }
 0x156   : > { %vm575_vm13 = vcmp.ge.f32.partialorder %v532_v38, 0.0  ;;  %v604_v40 = vmul.f32 0.2, %v532_v38  ;;  %v632_v41 = vsel %vm574_vm12, %v529_v34, %v603_v37 }
 0x158   : > { %v633_v42 = vsel %vm575_vm13, %v532_v38, %v604_v40 }
 0x159   : > { %v536_v43 = vpop.f32.mrb[52].mxu0  ;;  %v1060_v44 = vpack.c.bf16 %v633_v42, %v632_v41 }
 0x15a   : > { %v537_v45 = vadd.f32 %v1367_v22, %v536_v43  ;;  %v1017_v46 = vpop.f32.mrb[53].mxu0 }
 0x15b   : > { %v539_v47 = vpop.f32.mrb[54].mxu0  ;;  %1061 = vmatpush1.bf16.msra.mxu1 %v1060_v44 }
 0x15c   : > { %v605_v48 = vmul.f32 0.2, %v537_v45  ;;  %v540_v49 = vadd.f32 %v1367_v22, %v539_v47  ;;  %v1018_v50 = vpop.f32.mrb[55].mxu0  ;;  %1062 = vmatprep.subr.bf16.mxu1 %v1195_v18  ;;  %vm576_vm14 = vcmp.ge.f32.partialorder %v537_v45, 0.0  ;;  %v637_v18 = vld [vmem:[%s1521_s3] sm:$0xff] }
 0x15e   : > { %vm577_vm15 = vcmp.ge.f32.partialorder %v540_v49, 0.0  ;;  %v606_v51 = vmul.f32 0.2, %v540_v49  ;;  %v634_v52 = vsel %vm576_vm14, %v537_v45, %v605_v48 }
 0x160   : > { %v635_v53 = vsel %vm577_vm15, %v540_v49, %v606_v51 }
 0x161   : > { %v544_v54 = vpop.f32.mrb[56].mxu0  ;;  %v1063_v55 = vpack.c.bf16 %v635_v53, %v634_v52 }
 0x162   : > { %v545_v56 = vadd.f32 %v1367_v22, %v544_v54  ;;  %v1021_v57 = vpop.f32.mrb[57].mxu0  ;;  %v639_v22 = vld [vmem:[%s1521_s3 + $0x10] sm:$0xff] }
 0x163   : > { %v547_v58 = vpop.f32.mrb[58].mxu0  ;;  %1064 = vmatpush1.bf16.msra.mxu1 %v1063_v55 }
 0x164   : > { %vm578_vm0 = vcmp.ge.f32.partialorder %v545_v56, 0.0  ;;  %v607_v59 = vmul.f32 0.2, %v545_v56  ;;  %v1022_v60 = vpop.f32.mrb[59].mxu0  ;;  %738 = vmatprep.subr.mxu1 %v1193_v1  ;;  %v642_v1 = vld [vmem:[%s1521_s3 + $0x28] sm:$0xff] }
 0x166   : > { %v636_v61 = vsel %vm578_vm0, %v545_v56, %v607_v59 }
 0x167   : > { %921 = vmatpush1.msk.msra.mxu1 %vm678_vm1, %v636_v61 }
 0x168   : > { %747 = vmatmul.mubr.f32.vlgmr.msra.gmra.mrb[0].mxu1 %v637_v18 }
 0x169   : > { %923 = vmatprep.mubr.msk.f32.mxu1 %vm653_vm2, %v640_v62 }
 0x16c   : > { %752 = vmatmul.mubr.f32.gmra.mrb[2].mxu1 %v639_v22 }
 0x16d   : > { %924 = vmatprep.mubr.msk.f32.mxu1 %vm653_vm2, %v642_v1 }
 0x170   : > { %757 = vmatmul.mubr.f32.gmra.mrb[4].mxu1 %v641_v63 }
 0x171   : > { %925 = vmatprep.mubr.msk.f32.mxu1 %vm653_vm2, %v644_v0 }
 0x174   : > { %762 = vmatmul.mubr.f32.gmra.mrb[6].mxu1 %v643_v2 }
 0x175   : > { %926 = vmatprep.mubr.msk.f32.mxu1 %vm653_vm2, %v646_v3 }
 0x178   : > { %767 = vmatmul.mubr.f32.gmra.mrb[8].mxu1 %v645_v4 }
 0x179   : > { %927 = vmatprep.mubr.msk.f32.mxu1 %vm653_vm2, %v648_v5 }
 0x17c   : > { %772 = vmatmul.mubr.f32.gmra.mrb[10].mxu1 %v647_v6 }
 0x17d   : > { %928 = vmatprep.mubr.msk.f32.mxu1 %vm653_vm2, %v650_v7 }
 0x180   : > { %777 = vmatmul.mubr.f32.gmra.mrb[12].mxu1 %v649_v8 }
 0x181   : > { %929 = vmatprep.mubr.msk.f32.mxu1 %vm653_vm2, %v652_v9 }
 0x184   : > { %782 = vmatmul.mubr.f32.gmra.mrb[14].mxu1 %v651_v10 }
 0x23b   : > { %v748_v11 = vpop.f32.mrb[0].mxu1 }
 0x23c   : > { %787 = vst [vmem:[%s201_s23] sm:$0xff] %v748_v11  ;;  %v750_v12 = vpop.f32.mrb[1].mxu1 }
 0x23f   : > { %v753_v13 = vpop.f32.mrb[2].mxu1 }
 0x240   : > { %788 = vst [vmem:[%s201_s23 + $0x8] sm:$0xff] %v753_v13  ;;  %v755_v14 = vpop.f32.mrb[3].mxu1 }
 0x243   : > { %v758_v15 = vpop.f32.mrb[4].mxu1 }
 0x244   : > { %789 = vst [vmem:[%s201_s23 + $0x10] sm:$0xff] %v758_v15  ;;  %v760_v16 = vpop.f32.mrb[5].mxu1 }
 0x247   : > { %v763_v17 = vpop.f32.mrb[6].mxu1 }
 0x248   : > { %790 = vst [vmem:[%s201_s23 + $0x18] sm:$0xff] %v763_v17  ;;  %v765_v19 = vpop.f32.mrb[7].mxu1 }
 0x24b   : > { %v768_v20 = vpop.f32.mrb[8].mxu1 }
 0x24c   : > { %791 = vst [vmem:[%s201_s23 + $0x20] sm:$0xff] %v768_v20  ;;  %v770_v21 = vpop.f32.mrb[9].mxu1 }
 0x24f   : > { %v773_v23 = vpop.f32.mrb[10].mxu1 }
 0x250   : > { %792 = vst [vmem:[%s201_s23 + $0x28] sm:$0xff] %v773_v23  ;;  %v775_v24 = vpop.f32.mrb[11].mxu1 }
 0x253   : > { %v778_v25 = vpop.f32.mrb[12].mxu1 }
 0x254   : > { %793 = vst [vmem:[%s201_s23 + $0x30] sm:$0xff] %v778_v25  ;;  %v780_v26 = vpop.f32.mrb[13].mxu1 }
 0x257   : > { %v783_v27 = vpop.f32.mrb[14].mxu1 }
 0x258   : > { %794 = vst [vmem:[%s201_s23 + $0x38] sm:$0xff] %v783_v27  ;;  %v785_v28 = vpop.f32.mrb[15].mxu1 }
 0x259   : > { %1142 = shalt.err (!%p1139_p3)
}
 0x25a   : > { %s1143_s10 = scalar_lea.hbm %s1473_s5, 1024  ;;  %s1147_s13 = scalar_lea.hbm %s1522_s4, 2048 }
 0x25b   : > { %p1144_p4 = scmp.ne.s32.totalorder %s1473_s5, %s1143_s10  ;;  %p1148_p9 = scmp.lt.u32.totalorder %s1473_s5, %s1522_s4 }
 0x25c   : > { %p1149_p10 = scmp.lt.u32.totalorder %s1147_s13, %s1143_s10  ;;  %p1151_p12 = scmp.lt.u32.totalorder %s1143_s10, %s1473_s5 }
 0x25d   : > { %p1145_p7 = pnand %p1144_p4, %p1262_p5 }
 0x25e   : > { %p1150_p11 = por %p1149_p10, %p1148_p9 }
 0x25f   : > { %p1146_p8 = pneg %p1145_p7 }
 0x260   : > { %p1152_p13 = por %p1151_p12, %p1150_p11 }
 0x262   : > { %p1153_p0 = pnand %p1152_p13, %p1146_p8 }
 0x264   : > { %1156 = shalt.err (!%p1153_p0)
}
 0x265   : > { %s1197_s22 = smov 128   ;;  %s1198_s23 = smov 8  }
 0x266   : > { %1066 = dma.vmem_to_hbm [thread:$0]  (%p1262_p5), %s1468_s27, 1024, %s1473_s5, %s1477_s6, %s1197_s22, %s1197_s22, %s1198_s23  }
 0x267 PF: > { %p1072_p1 = scmp.ge.s32.totalorder %s1191_s18, 2  ;;  %s824_s28 = sand.u32 1, %s1179_s15  }
 0x268   : > { %s825_s29 = scalar_lea.sflag [#allocation3], %s824_s28 }
 0x269   : > { %p1069_p2 = pnand %p1072_p1, %p1266_p6 }
 0x26b   : > { %1174 = dma.done.wait (!%p1069_p2), %s825_s29, 1024  }
 0x26c   : > { %1176 = vsyncadd (!%p1069_p2), %s825_s29, 4294966272  ;;  %p14_p3 = scmp.ge.s32.totalorder %s1249_s21, 4   ;;  %s1525_s15 = smov %s1183_s16 }
 0x26d   : > { %s1526_s16 = smov %s1187_s17  ;;  %s1527_s17 = smov %s1260_s24 }
 0x26e   : > { %s1528_s18 = smov %s1249_s21  ;;  %16 = sbr.rel (!%p14_p3) target bundleno = 3 (0x3), region = 74 }
 0x275   :  { %830 = vsyncpa [#allocation3], 1 }
 0x276   :  { %832 = vsyncpa [#allocation3 + $0x1], 1 }

</bundles_post_ra>
